<compile_context>
chip_gen: v7x
topology: tpu7x:2x2x1
jax: 0.10.0
libtpu: 0.0.40
codegen_flags: <defaults>
</compile_context>

<pallas_src>
import jax
import jax.numpy as jnp
import numpy as np
from jax import lax
from jax.experimental import pallas as pl
from jax.experimental.pallas import tpu as pltpu


def _cdiv(a, b):
    return -(-a // b)


def _round_up(a, b):
    return _cdiv(a, b) * b


# ----------------------------- Pallas kernel ------------------------------ #
def _patch_embed_kernel(p_ref, w_ref, b_ref, o_ref):
    # p_ref: (rows, pack*K) bf16 patch tile
    # w_ref: (pack*K, pack*d_model) bf16 (block-diagonal replicated weight)
    # b_ref: (1, pack*d_model) f32 bias
    acc = jnp.dot(p_ref[...], w_ref[...], preferred_element_type=jnp.float32)
    o_ref[...] = (acc + b_ref[...]).astype(o_ref.dtype)


def token_embedding_s(x, weight, bias, *, patch_size, tm=1024):
    """x: (N, C, H, W) float32 (NCHW, like PyTorch).
       weight: (d_model, C, p, p), bias: (d_model,).
       returns (N, S, d_model) with S = (H//p) * (W//p)."""
    N, C, H, W = x.shape
    d_model = weight.shape[0]
    p = patch_size
    nh, nw = H // p, W // p
    S = nh * nw
    K = C * p * p
    M = N * S
    out_dtype = x.dtype
    out_bytes = jnp.dtype(out_dtype).itemsize

    # Lane-packing factor: make the output block 128-lane dense when d_model
    # is small.  pack == 1 for realistic d_model (multiples of 128).
    if d_model < 128 and 128 % d_model == 0:
        pack = 128 // d_model
    else:
        pack = 1

    cols_in = pack * K            # kernel input lane width
    cols_out = pack * d_model     # kernel output lane width (>= 128 when packed)

    # M-tile selection: biggest tile (<= tm) aligned so the packed block keeps
    # >= 8 sublanes, clamped by a VMEM budget (double-buffered in/out tiles),
    # with small problems split into two balanced steps (v7x dual TC).
    row_align = max(16, 8 * pack)
    per_row_bytes = 2 * (cols_in * 2 + cols_out * out_bytes)   # 2x = double buffer
    vmem_budget = 12 * 1024 * 1024
    tm_cap = max(row_align,
                 (vmem_budget // max(per_row_bytes, 1)) // row_align * row_align)
    tm = max(row_align, min(tm, tm_cap))

    if M <= 2 * tm:
        tm_eff = _round_up(_cdiv(M, 2), row_align) if M > row_align else row_align
    else:
        tm_eff = _round_up(tm, row_align)
    M_pad = _round_up(M, tm_eff)
    grid = M_pad // tm_eff

    # --- glue: patchify (matches conv with stride == kernel_size), bf16 ---
    xb = x.astype(jnp.bfloat16)
    patches = xb.reshape(N, C, nh, p, nw, p).transpose(0, 2, 4, 1, 3, 5)
    patches = patches.reshape(M, K)
    if M_pad != M:
        patches = jnp.pad(patches, ((0, M_pad - M), (0, 0)))
    patches = patches.reshape(M_pad // pack, cols_in)        # fold rows into lanes

    # --- glue: conv weight -> (K, d_model) operand, block-diagonal replicated ---
    w_mat = weight.reshape(d_model, K).T.astype(jnp.bfloat16)       # (K, d_model)
    if pack > 1:
        eye = jnp.eye(pack, dtype=jnp.bfloat16)
        w_mat = (eye[:, None, :, None] * w_mat[None, :, None, :]).reshape(
            pack * K, pack * d_model)
    b_mat = jnp.tile(bias.reshape(1, d_model).astype(jnp.float32), (1, pack))

    rows_blk = tm_eff // pack          # sublane rows per grid step (multiple of 8)

    cost = pl.CostEstimate(
        flops=2 * M_pad * pack * K * d_model,
        transcendentals=0,
        bytes_accessed=((M_pad // pack) * cols_in * 2
                        + cols_in * cols_out * 2
                        + cols_out * 4
                        + (M_pad // pack) * cols_out * out_bytes))

    out_packed = pl.pallas_call(
        _patch_embed_kernel,
        out_shape=jax.ShapeDtypeStruct((M_pad // pack, cols_out), out_dtype),
        grid_spec=pltpu.PrefetchScalarGridSpec(
            num_scalar_prefetch=0,
            grid=(grid,),
            in_specs=[
                pl.BlockSpec((rows_blk, cols_in), lambda i: (i, 0)),   # patch tile
                pl.BlockSpec((cols_in, cols_out), lambda i: (0, 0)),   # weight (resident)
                pl.BlockSpec((1, cols_out), lambda i: (0, 0)),         # bias (resident)
            ],
            out_specs=pl.BlockSpec((rows_blk, cols_out), lambda i: (i, 0)),
        ),
        compiler_params=pltpu.CompilerParams(
            dimension_semantics=("parallel",)),
        cost_estimate=cost,
    )(patches, w_mat, b_mat)

    out_flat = out_packed.reshape(M_pad, d_model)[:M]
    return out_flat.reshape(N, S, d_model)


# ------------------------- deterministic parameters ------------------------ #
def init_params(key, c_in, d_model, patch_size):
    """Mimics nn.Conv2d + kaiming_normal_(mode='fan_in', nonlinearity='leaky_relu')."""
    p = patch_size
    fan_in = c_in * p * p
    gain = np.sqrt(2.0 / (1.0 + 0.01 ** 2))        # leaky_relu, slope=0.01
    std = gain / np.sqrt(fan_in)
    k_w, k_b = jax.random.split(key)
    weight = std * jax.random.normal(k_w, (d_model, c_in, p, p), dtype=jnp.float32)
    bound = 1.0 / np.sqrt(fan_in)                  # default Conv2d bias init
    bias = jax.random.uniform(k_b, (d_model,), dtype=jnp.float32,
                              minval=-bound, maxval=bound)
    return weight, bias


# ------------------------------- reference -------------------------------- #
def reference(x, weight, bias, patch_size):
    p = patch_size
    y = lax.conv_general_dilated(
        x, weight, window_strides=(p, p), padding="VALID",
        dimension_numbers=("NCHW", "OIHW", "NCHW"))
    y = y + bias.reshape(1, -1, 1, 1)
    N, C, Ho, Wo = y.shape
    y = y.reshape(N, C, Ho * Wo)            # flatten(2)
    return jnp.einsum("ncs->nsc", y)        # (N, S, d_model)


if __name__ == "__main__":
    # small shapes consistent with the module's forward
    N, c_in, H, W = 2, 4, 16, 16
    patch_size = 4
    d_model = 32

    key = jax.random.PRNGKey(0)
    k_x, k_p = jax.random.split(key)
    x = jax.random.normal(k_x, (N, c_in, H, W), dtype=jnp.float32)
    weight, bias = init_params(k_p, c_in, d_model, patch_size)

    fn = jax.jit(token_embedding_s, static_argnames=("patch_size", "tm"))
    out = fn(x, weight, bias, patch_size=patch_size)
    out = jax.block_until_ready(out)

    ref = reference(x, weight, bias, patch_size)
    assert out.shape == (N, (H // patch_size) * (W // patch_size), d_model)
    # bf16 MXU operands with f32 accumulation -> slightly looser tolerance
    assert jnp.allclose(out, ref, atol=5e-2, rtol=5e-2)

    print("KERNEL_OK")
</pallas_src>

<mosaic_0001>
module attributes {stable_mosaic.version = 11 : i64} {
  func.func @_patch_embed_kernel(%arg0: i32, %arg1: memref<8x256xbf16, #tpu.memory_space<vmem>>, %arg2: memref<256x128xbf16, #tpu.memory_space<vmem>>, %arg3: memref<1x128xf32, #tpu.memory_space<vmem>>, %arg4: memref<8x128xf32, #tpu.memory_space<vmem>>) attributes {dimension_semantics = [#tpu.dimension_semantics<parallel>], iteration_bounds = array<i64: 1>, scalar_prefetch = 0 : i64, scratch_operands = 0 : i64, tpu.core_type = #tpu.core_type<tc>, window_params = [{transform_indices = @transform_0, window_bounds = array<i64: 8, 256>}, {pipeline_mode = #tpu.pipeline_mode<synchronous>, transform_indices = @transform_1, window_bounds = array<i64: 256, 128>}, {pipeline_mode = #tpu.pipeline_mode<synchronous>, transform_indices = @transform_2, window_bounds = array<i64: 1, 128>}, {transform_indices = @transform_3, window_bounds = array<i64: 8, 128>}]} {
    %c0 = arith.constant 0 : index
    %c0_0 = arith.constant 0 : index
    %0 = vector.load %arg1[%c0, %c0_0] : memref<8x256xbf16, #tpu.memory_space<vmem>>, vector<8x256xbf16>
    %c0_1 = arith.constant 0 : index
    %c0_2 = arith.constant 0 : index
    %1 = vector.load %arg2[%c0_1, %c0_2] : memref<256x128xbf16, #tpu.memory_space<vmem>>, vector<256x128xbf16>
    %cst = arith.constant dense<0.000000e+00> : vector<8x128xf32>
    %2 = tpu.matmul %0, %1, %cst {dimension_numbers = #tpu.dot_dimension_numbers<[1], [0], [0], [1], [0, 0, 1, 1], [], []>} : vector<8x256xbf16>, vector<256x128xbf16>, vector<8x128xf32> -> vector<8x128xf32>
    %c0_3 = arith.constant 0 : index
    %c0_4 = arith.constant 0 : index
    %3 = vector.load %arg3[%c0_3, %c0_4] : memref<1x128xf32, #tpu.memory_space<vmem>>, vector<1x128xf32>
    %4 = vector.broadcast %3 : vector<1x128xf32> to vector<8x128xf32>
    %5 = arith.addf %2, %4 : vector<8x128xf32>
    %c0_5 = arith.constant 0 : index
    %c0_6 = arith.constant 0 : index
    %6 = vector.load %arg4[%c0_5, %c0_6] : memref<8x128xf32, #tpu.memory_space<vmem>>, vector<8x128xf32>
    tpu.vector_store %arg4[%c0_5, %c0_6], %5 {strides = array<i32>} : memref<8x128xf32, #tpu.memory_space<vmem>>, vector<8x128xf32>,
    return
  }
  func.func @transform_0(%arg0: i32) -> (i32, i32) {
    %c0_i32 = arith.constant 0 : i32
    %c0_i32_0 = arith.constant 0 : i32
    return %arg0, %c0_i32 : i32, i32
  }
  func.func @transform_1(%arg0: i32) -> (i32, i32) {
    %c0_i32 = arith.constant 0 : i32
    %c0_i32_0 = arith.constant 0 : i32
    %c0_i32_1 = arith.constant 0 : i32
    return %c0_i32, %c0_i32_0 : i32, i32
  }
  func.func @transform_2(%arg0: i32) -> (i32, i32) {
    %c0_i32 = arith.constant 0 : i32
    %c0_i32_0 = arith.constant 0 : i32
    %c0_i32_1 = arith.constant 0 : i32
    return %c0_i32, %c0_i32_0 : i32, i32
  }
  func.func @transform_3(%arg0: i32) -> (i32, i32) {
    %c0_i32 = arith.constant 0 : i32
    %c0_i32_0 = arith.constant 0 : i32
    return %arg0, %c0_i32 : i32, i32
  }
}

</mosaic_0001>

<bundles_post_ra>
// kernel: token_embedding_s.1
= control target key start
LH: loop header
LB: loop body
LE: loop exit
PB: predicated region body
PF: predicated region fallthrough
CT: control target
= control target key end

     0   :  { %s339_s1 = inlined_call_operand.vmem [shape: bf16[256,128], index: 1, kind: input, shape index: {}]   ;;  %s340_s0 = inlined_call_operand.vmem [shape: bf16[8,256], index: 0, kind: input, shape index: {}]   ;;  %s341_s2 = inlined_call_operand.vmem [shape: f32[1,128], index: 2, kind: input, shape index: {}]   ;;  %s342_s3 = inlined_call_operand.vmem [shape: f32[8,128], index: 3, kind: output, shape index: {}]  }
   0x1   :  { %v244_v0 = vld [vmem:[%s339_s1 + $0x40] sm:$0xff]   ;;  %v246_v2 = vld [vmem:[%s339_s1 + $0x48] sm:$0xff]   ;;  %v248_v4 = vld [vmem:[%s339_s1 + $0x50] sm:$0xff]  }
   0x2   :  { %v245_v1 = vld [vmem:[%s339_s1] sm:$0xff]   ;;  %222 = vmatprep.subr.bf16.mxu0 %v244_v0  ;;  %v247_v3 = vld [vmem:[%s339_s1 + $0x8] sm:$0xff]   ;;  %v249_v5 = vld [vmem:[%s339_s1 + $0x10] sm:$0xff]  }
   0x3   :  { %223 = vmatpush3.bf16.msra.mxu0 %v245_v1  ;;  %v250_v6 = vld [vmem:[%s339_s1 + $0x58] sm:$0xff]   ;;  %v252_v8 = vld [vmem:[%s339_s1 + $0x60] sm:$0xff]   ;;  %v254_v10 = vld [vmem:[%s339_s1 + $0x68] sm:$0xff]  }
   0x4   :  { %224 = vmatprep.subr.bf16.mxu0 %v246_v2  ;;  %v251_v7 = vld [vmem:[%s339_s1 + $0x18] sm:$0xff]   ;;  %v253_v9 = vld [vmem:[%s339_s1 + $0x20] sm:$0xff]   ;;  %v255_v13 = vld [vmem:[%s339_s1 + $0x28] sm:$0xff]  }
   0x5   :  { %v15_v11 = vld [vmem:[%s340_s0] sm:$0xff]  ;;  %v256_v14 = vld [vmem:[%s339_s1 + $0x70] sm:$0xff]   ;;  %v258_v16 = vld [vmem:[%s339_s1 + $0x78] sm:$0xff]  }
   0x6   :  { %v205_v12 = vcombine.high %v15_v11, %v15_v11  ;;  %v257_v15 = vld [vmem:[%s339_s1 + $0x30] sm:$0xff]   ;;  %v259_v17 = vld [vmem:[%s339_s1 + $0x38] sm:$0xff]   ;;  %v204_v18 = vcombine.low %v15_v11, %v15_v11  ;;  %v203_v20 = vld [vmem:[%s341_s2] ss:$0 sm:$0xff] }
   0x7   :  { %225 = vmatpush3.bf16.msra.mxu0 %v247_v3 }
   0x8   :  { %226 = vmatprep.subr.bf16.mxu0 %v248_v4  ;;  %190 = vmatprep.mubr.bf16.mxu0 %v205_v12 }
   0xb   :  { %227 = vmatpush3.bf16.msra.mxu0 %v249_v5 }
   0xc   :  { %228 = vmatprep.subr.bf16.mxu0 %v250_v6 }
   0xf   :  { %229 = vmatpush3.bf16.msra.mxu0 %v251_v7 }
  0x10   :  { %230 = vmatprep.subr.bf16.mxu0 %v252_v8 }
  0x13   :  { %231 = vmatpush3.bf16.msra.mxu0 %v253_v9 }
  0x14   :  { %232 = vmatprep.subr.bf16.mxu0 %v254_v10 }
  0x17   :  { %233 = vmatpush3.bf16.msra.mxu0 %v255_v13 }
  0x18   :  { %234 = vmatprep.subr.bf16.mxu0 %v256_v14 }
  0x1b   :  { %235 = vmatpush3.bf16.msra.mxu0 %v257_v15 }
  0x1c   :  { %236 = vmatprep.subr.bf16.mxu0 %v258_v16 }
  0x1f   :  { %237 = vmatpush3.bf16.msra.mxu0 %v259_v17 }
  0x22   :  { %191 = vmatmul.mubr.bf16.vlgmr.msra.gmra.mrb[0].mxu0 %v204_v18 }
  0xf5   :  { %v238_v19 = vpop.f32.mrb[0].mxu0 }
  0xf6   :  { %v239_v21 = vpop.f32.mrb[1].mxu0 }
  0xf7   :  { %v240_v22 = vadd.f32 %v239_v21, %v238_v19  ;;  %v241_v23 = vpop.f32.mrb[2].mxu0 }
  0xf8   :  { %v242_v24 = vpop.f32.mrb[3].mxu0 }
  0xf9   :  { %v193_v25 = vadd.f32 %v240_v22, %v203_v20 }
  0xfb   :  { %198 = vst [vmem:[%s342_s3] sm:$0xff] %v193_v25 }

</bundles_post_ra>
